<compile_context>
chip_gen: v7x
topology: tpu7x:2x2x1
jax: 0.10.0
libtpu: 0.0.40
codegen_flags: <defaults>
</compile_context>

<pallas_src>
import functools

import jax
import jax.numpy as jnp
from jax.experimental import pallas as pl
from jax.experimental.pallas import tpu as pltpu

LANE = 128


def _round_up(v, m):
    return ((v + m - 1) // m) * m


# --------------------------------------------------------------------------
# Fused multi-layer kernel: adj / x / all (W, b) live as full-extent VMEM
# blocks; layers are statically unrolled so intermediates never leave VMEM.
# --------------------------------------------------------------------------
def _gnn_fused_kernel(*refs, num_layers):
    """refs = (adj, x, w0, b0, w1, b1, ..., out)."""
    adj_ref = refs[0]
    x_ref = refs[1]
    wb_refs = refs[2:2 + 2 * num_layers]
    o_ref = refs[2 + 2 * num_layers]

    adj = adj_ref[...]          # bf16 [N, N]      -- loaded once for all layers
    h = x_ref[...]              # bf16 [N, F_pad]
    out = None
    for i in range(num_layers):            # static unroll over layers
        w = wb_refs[2 * i][...]            # bf16 [F_pad_i, F_pad_{i+1}]
        b = wb_refs[2 * i + 1][...]        # f32  [1, F_pad_{i+1}]
        # Feature transform on the MXU: bf16 inputs, f32 accumulation.
        xw = jnp.dot(h, w, preferred_element_type=jnp.float32)
        # Neighborhood aggregation on the MXU.
        agg = jnp.dot(adj, xw.astype(jnp.bfloat16),
                      preferred_element_type=jnp.float32)
        out = agg + b                      # bias add in f32 (VPU)
        if i != num_layers - 1:
            out = jnp.maximum(out, 0.0)    # ReLU on all but the last layer
            h = out.astype(jnp.bfloat16)   # next layer's input stays in VMEM
    o_ref[...] = out.astype(o_ref.dtype)   # lane-dense (128-wide) store


# --------------------------------------------------------------------------
# Jitted per-call path: pad x, run the fused kernel, strip lane padding.
# Weights/bias are already padded+cast (hoisted to init); adj is already bf16.
# --------------------------------------------------------------------------
@functools.partial(jax.jit,
                   static_argnames=("pdims", "f_out", "out_dtype"))
def _gnn_forward_jit(x, adj_b, wb_flat, *, pdims, f_out, out_dtype):
    n, f_in = x.shape
    num_layers = len(wb_flat) // 2

    # Pad node features to a lane-dense width (fused into the jit graph).
    x_p = jnp.zeros((n, pdims[0]), jnp.bfloat16).at[:, :f_in].set(
        x.astype(jnp.bfloat16))

    in_arrays = [adj_b, x_p] + list(wb_flat)
    kernel = functools.partial(_gnn_fused_kernel, num_layers=num_layers)

    out_pad = pl.pallas_call(
        kernel,
        out_shape=jax.ShapeDtypeStruct((n, pdims[-1]), out_dtype),
        grid_spec=pl.GridSpec(
            grid=(1,),
            in_specs=[pl.BlockSpec(a.shape, lambda i: (0, 0))
                      for a in in_arrays],
            out_specs=pl.BlockSpec((n, pdims[-1]), lambda i: (0, 0)),
        ),
        compiler_params=pltpu.CompilerParams(
            dimension_semantics=("arbitrary",),
        ),
    )(*in_arrays)
    # Strip the lane padding off the final classifier output (inside jit).
    return out_pad[:, :f_out]


class GNNPallas:
    """Holds pre-padded parameters and the cached bf16 adjacency.

    Mirrors the PyTorch `GNN.forward`: ReLU after every layer but the last.
    """

    def __init__(self, params, adj_t, out_dtype=jnp.float32):
        # params: list of (W [F_in, F_out], b [1, F_out]) as f32 arrays.
        self.num_layers = len(params)
        self.f_in = params[0][0].shape[0]
        self.f_out = params[-1][0].shape[1]
        self.out_dtype = out_dtype

        dims = [self.f_in] + [w.shape[1] for (w, _) in params]
        self.pdims = tuple(_round_up(d, LANE) for d in dims)

        # Hoisted once: pad + cast weights/biases to lane-dense shapes.
        wb = []
        for i, (w, b) in enumerate(params):
            di, do = w.shape
            w_p = jnp.zeros((self.pdims[i], self.pdims[i + 1]),
                            jnp.bfloat16).at[:di, :do].set(
                                w.astype(jnp.bfloat16))
            b_p = jnp.zeros((1, self.pdims[i + 1]),
                            jnp.float32).at[:, :do].set(b.astype(jnp.float32))
            wb += [w_p, b_p]
        self.wb_flat = tuple(jax.block_until_ready(a) for a in wb)

        # Hoisted once: the normalized adjacency is static per graph.
        self.adj_b = jax.block_until_ready(adj_t.astype(jnp.bfloat16))

    def __call__(self, x):
        return _gnn_forward_jit(x, self.adj_b, self.wb_flat,
                                pdims=self.pdims, f_out=self.f_out,
                                out_dtype=self.out_dtype)


# --------------------------------------------------------------------------
# References
# --------------------------------------------------------------------------
def _reference_forward_f32(x, adj_t, params):
    n_layers = len(params)
    for i, (w, b) in enumerate(params):
        x = adj_t @ (x @ w) + b
        if i != n_layers - 1:
            x = jnp.maximum(x, 0.0)
    return x


def _reference_forward_bf16(x, adj_t, params):
    """Emulates the kernel's bf16-input / f32-accumulate matmuls."""
    n_layers = len(params)
    adj_b = adj_t.astype(jnp.bfloat16)
    h = x.astype(jnp.bfloat16)
    out = None
    for i, (w, b) in enumerate(params):
        xw = jnp.dot(h, w.astype(jnp.bfloat16),
                     preferred_element_type=jnp.float32)
        out = jnp.dot(adj_b, xw.astype(jnp.bfloat16),
                      preferred_element_type=jnp.float32) + b
        if i != n_layers - 1:
            out = jnp.maximum(out, 0.0)
            h = out.astype(jnp.bfloat16)
    return out


def _make_normalized_adjacency(key, n):
    """Deterministic symmetric normalized adjacency with self-loops."""
    a = (jax.random.uniform(key, (n, n)) < 0.2).astype(jnp.float32)
    a = jnp.maximum(a, a.T)                      # symmetrize
    a = a + jnp.eye(n, dtype=jnp.float32)        # self-loops
    a = jnp.minimum(a, 1.0)
    deg = jnp.sum(a, axis=1)
    d_inv_sqrt = 1.0 / jnp.sqrt(deg)
    return a * d_inv_sqrt[:, None] * d_inv_sqrt[None, :]


if __name__ == "__main__":
    key = jax.random.PRNGKey(0)
    k_adj, k_x, k_p = jax.random.split(key, 3)

    # Small graph: 64 nodes, 32 input features, hidden 32, 16 output classes.
    num_nodes, f_in, f_hidden, f_out = 64, 32, 32, 16

    adj_t = _make_normalized_adjacency(k_adj, num_nodes)
    x = jax.random.normal(k_x, (num_nodes, f_in), dtype=jnp.float32)

    # Deterministic Glorot-uniform-ish init for 3 GCN layers.
    layer_dims = [(f_in, f_hidden), (f_hidden, f_hidden), (f_hidden, f_out)]
    params = []
    pkeys = jax.random.split(k_p, len(layer_dims))
    for pk, (di, do) in zip(pkeys, layer_dims):
        limit = (6.0 / (di + do)) ** 0.5
        w = jax.random.uniform(pk, (di, do), minval=-limit, maxval=limit,
                               dtype=jnp.float32)
        b = jnp.zeros((1, do), dtype=jnp.float32)
        params.append((w, b))

    # Build the model once (padding/casting of params + adj hoisted here).
    model = GNNPallas(params, adj_t)

    # First call compiles; second call is the fast path. Both verified.
    out = jax.block_until_ready(model(x))
    out2 = jax.block_until_ready(model(x))

    ref_bf16 = _reference_forward_bf16(x, adj_t, params)
    ref_f32 = _reference_forward_f32(x, adj_t, params)

    assert out.shape == (num_nodes, f_out)
    assert jnp.allclose(out, out2), "jitted forward is not deterministic"
    # Tight check vs a reference that emulates the kernel's bf16/f32 matmuls.
    assert jnp.allclose(out, ref_bf16, atol=1e-3, rtol=1e-3), \
        "mismatch vs bf16-emulating reference"
    # Looser check vs the pure-f32 reference (bf16 MXU inputs).
    assert jnp.allclose(out, ref_f32, atol=5e-2, rtol=5e-2), \
        "mismatch vs f32 reference"

    print("KERNEL_OK")
</pallas_src>

<mosaic_0001>
module attributes {stable_mosaic.version = 11 : i64} {
  func.func @_gnn_fused_kernel(%arg0: i32, %arg1: memref<64x64xbf16, #tpu.memory_space<vmem>>, %arg2: memref<64x128xbf16, #tpu.memory_space<vmem>>, %arg3: memref<128x128xbf16, #tpu.memory_space<vmem>>, %arg4: memref<1x128xf32, #tpu.memory_space<vmem>>, %arg5: memref<128x128xbf16, #tpu.memory_space<vmem>>, %arg6: memref<1x128xf32, #tpu.memory_space<vmem>>, %arg7: memref<128x128xbf16, #tpu.memory_space<vmem>>, %arg8: memref<1x128xf32, #tpu.memory_space<vmem>>, %arg9: memref<64x128xf32, #tpu.memory_space<vmem>>) attributes {dimension_semantics = [#tpu.dimension_semantics<arbitrary>], iteration_bounds = array<i64: 1>, scalar_prefetch = 0 : i64, scratch_operands = 0 : i64, tpu.core_type = #tpu.core_type<tc>, window_params = [{pipeline_mode = #tpu.pipeline_mode<synchronous>, transform_indices = @transform_0, window_bounds = array<i64: 64, 64>}, {pipeline_mode = #tpu.pipeline_mode<synchronous>, transform_indices = @transform_1, window_bounds = array<i64: 64, 128>}, {pipeline_mode = #tpu.pipeline_mode<synchronous>, transform_indices = @transform_2, window_bounds = array<i64: 128, 128>}, {pipeline_mode = #tpu.pipeline_mode<synchronous>, transform_indices = @transform_3, window_bounds = array<i64: 1, 128>}, {pipeline_mode = #tpu.pipeline_mode<synchronous>, transform_indices = @transform_4, window_bounds = array<i64: 128, 128>}, {pipeline_mode = #tpu.pipeline_mode<synchronous>, transform_indices = @transform_5, window_bounds = array<i64: 1, 128>}, {pipeline_mode = #tpu.pipeline_mode<synchronous>, transform_indices = @transform_6, window_bounds = array<i64: 128, 128>}, {pipeline_mode = #tpu.pipeline_mode<synchronous>, transform_indices = @transform_7, window_bounds = array<i64: 1, 128>}, {pipeline_mode = #tpu.pipeline_mode<synchronous>, transform_indices = @transform_8, window_bounds = array<i64: 64, 128>}]} {
    %c0 = arith.constant 0 : index
    %c0_0 = arith.constant 0 : index
    %0 = vector.load %arg1[%c0, %c0_0] : memref<64x64xbf16, #tpu.memory_space<vmem>>, vector<64x64xbf16>
    %c0_1 = arith.constant 0 : index
    %c0_2 = arith.constant 0 : index
    %1 = vector.load %arg2[%c0_1, %c0_2] : memref<64x128xbf16, #tpu.memory_space<vmem>>, vector<64x128xbf16>
    %c0_3 = arith.constant 0 : index
    %c0_4 = arith.constant 0 : index
    %2 = vector.load %arg3[%c0_3, %c0_4] : memref<128x128xbf16, #tpu.memory_space<vmem>>, vector<128x128xbf16>
    %c0_5 = arith.constant 0 : index
    %c0_6 = arith.constant 0 : index
    %3 = vector.load %arg4[%c0_5, %c0_6] : memref<1x128xf32, #tpu.memory_space<vmem>>, vector<1x128xf32>
    %cst = arith.constant dense<0.000000e+00> : vector<64x128xf32>
    %4 = tpu.matmul %1, %2, %cst {dimension_numbers = #tpu.dot_dimension_numbers<[1], [0], [0], [1], [0, 0, 1, 1], [], []>} : vector<64x128xbf16>, vector<128x128xbf16>, vector<64x128xf32> -> vector<64x128xf32>
    %5 = arith.truncf %4 : vector<64x128xf32> to vector<64x128xbf16>
    %cst_7 = arith.constant dense<0.000000e+00> : vector<64x128xf32>
    %6 = tpu.matmul %0, %5, %cst_7 {dimension_numbers = #tpu.dot_dimension_numbers<[1], [0], [0], [1], [0, 0, 1, 1], [], []>} : vector<64x64xbf16>, vector<64x128xbf16>, vector<64x128xf32> -> vector<64x128xf32>
    %7 = vector.broadcast %3 : vector<1x128xf32> to vector<64x128xf32>
    %8 = arith.addf %6, %7 : vector<64x128xf32>
    %cst_8 = arith.constant 0.000000e+00 : f32
    %9 = vector.broadcast %cst_8 : f32 to vector<64x128xf32>
    %10 = arith.maximumf %8, %9 : vector<64x128xf32>
    %11 = arith.truncf %10 : vector<64x128xf32> to vector<64x128xbf16>
    %c0_9 = arith.constant 0 : index
    %c0_10 = arith.constant 0 : index
    %12 = vector.load %arg5[%c0_9, %c0_10] : memref<128x128xbf16, #tpu.memory_space<vmem>>, vector<128x128xbf16>
    %c0_11 = arith.constant 0 : index
    %c0_12 = arith.constant 0 : index
    %13 = vector.load %arg6[%c0_11, %c0_12] : memref<1x128xf32, #tpu.memory_space<vmem>>, vector<1x128xf32>
    %cst_13 = arith.constant dense<0.000000e+00> : vector<64x128xf32>
    %14 = tpu.matmul %11, %12, %cst_13 {dimension_numbers = #tpu.dot_dimension_numbers<[1], [0], [0], [1], [0, 0, 1, 1], [], []>} : vector<64x128xbf16>, vector<128x128xbf16>, vector<64x128xf32> -> vector<64x128xf32>
    %15 = arith.truncf %14 : vector<64x128xf32> to vector<64x128xbf16>
    %cst_14 = arith.constant dense<0.000000e+00> : vector<64x128xf32>
    %16 = tpu.matmul %0, %15, %cst_14 {dimension_numbers = #tpu.dot_dimension_numbers<[1], [0], [0], [1], [0, 0, 1, 1], [], []>} : vector<64x64xbf16>, vector<64x128xbf16>, vector<64x128xf32> -> vector<64x128xf32>
    %17 = vector.broadcast %13 : vector<1x128xf32> to vector<64x128xf32>
    %18 = arith.addf %16, %17 : vector<64x128xf32>
    %cst_15 = arith.constant 0.000000e+00 : f32
    %19 = vector.broadcast %cst_15 : f32 to vector<64x128xf32>
    %20 = arith.maximumf %18, %19 : vector<64x128xf32>
    %21 = arith.truncf %20 : vector<64x128xf32> to vector<64x128xbf16>
    %c0_16 = arith.constant 0 : index
    %c0_17 = arith.constant 0 : index
    %22 = vector.load %arg7[%c0_16, %c0_17] : memref<128x128xbf16, #tpu.memory_space<vmem>>, vector<128x128xbf16>
    %c0_18 = arith.constant 0 : index
    %c0_19 = arith.constant 0 : index
    %23 = vector.load %arg8[%c0_18, %c0_19] : memref<1x128xf32, #tpu.memory_space<vmem>>, vector<1x128xf32>
    %cst_20 = arith.constant dense<0.000000e+00> : vector<64x128xf32>
    %24 = tpu.matmul %21, %22, %cst_20 {dimension_numbers = #tpu.dot_dimension_numbers<[1], [0], [0], [1], [0, 0, 1, 1], [], []>} : vector<64x128xbf16>, vector<128x128xbf16>, vector<64x128xf32> -> vector<64x128xf32>
    %25 = arith.truncf %24 : vector<64x128xf32> to vector<64x128xbf16>
    %cst_21 = arith.constant dense<0.000000e+00> : vector<64x128xf32>
    %26 = tpu.matmul %0, %25, %cst_21 {dimension_numbers = #tpu.dot_dimension_numbers<[1], [0], [0], [1], [0, 0, 1, 1], [], []>} : vector<64x64xbf16>, vector<64x128xbf16>, vector<64x128xf32> -> vector<64x128xf32>
    %27 = vector.broadcast %23 : vector<1x128xf32> to vector<64x128xf32>
    %28 = arith.addf %26, %27 : vector<64x128xf32>
    %c0_22 = arith.constant 0 : index
    %c0_23 = arith.constant 0 : index
    %29 = vector.load %arg9[%c0_22, %c0_23] : memref<64x128xf32, #tpu.memory_space<vmem>>, vector<64x128xf32>
    tpu.vector_store %arg9[%c0_22, %c0_23], %28 {strides = array<i32>} : memref<64x128xf32, #tpu.memory_space<vmem>>, vector<64x128xf32>,
    return
  }
  func.func @transform_0(%arg0: i32) -> (i32, i32) {
    %c0_i32 = arith.constant 0 : i32
    %c0_i32_0 = arith.constant 0 : i32
    %c0_i32_1 = arith.constant 0 : i32
    return %c0_i32, %c0_i32_0 : i32, i32
  }
  func.func @transform_1(%arg0: i32) -> (i32, i32) {
    %c0_i32 = arith.constant 0 : i32
    %c0_i32_0 = arith.constant 0 : i32
    %c0_i32_1 = arith.constant 0 : i32
    return %c0_i32, %c0_i32_0 : i32, i32
  }
  func.func @transform_2(%arg0: i32) -> (i32, i32) {
    %c0_i32 = arith.constant 0 : i32
    %c0_i32_0 = arith.constant 0 : i32
    %c0_i32_1 = arith.constant 0 : i32
    return %c0_i32, %c0_i32_0 : i32, i32
  }
  func.func @transform_3(%arg0: i32) -> (i32, i32) {
    %c0_i32 = arith.constant 0 : i32
    %c0_i32_0 = arith.constant 0 : i32
    %c0_i32_1 = arith.constant 0 : i32
    return %c0_i32, %c0_i32_0 : i32, i32
  }
  func.func @transform_4(%arg0: i32) -> (i32, i32) {
    %c0_i32 = arith.constant 0 : i32
    %c0_i32_0 = arith.constant 0 : i32
    %c0_i32_1 = arith.constant 0 : i32
    return %c0_i32, %c0_i32_0 : i32, i32
  }
  func.func @transform_5(%arg0: i32) -> (i32, i32) {
    %c0_i32 = arith.constant 0 : i32
    %c0_i32_0 = arith.constant 0 : i32
    %c0_i32_1 = arith.constant 0 : i32
    return %c0_i32, %c0_i32_0 : i32, i32
  }
  func.func @transform_6(%arg0: i32) -> (i32, i32) {
    %c0_i32 = arith.constant 0 : i32
    %c0_i32_0 = arith.constant 0 : i32
    %c0_i32_1 = arith.constant 0 : i32
    return %c0_i32, %c0_i32_0 : i32, i32
  }
  func.func @transform_7(%arg0: i32) -> (i32, i32) {
    %c0_i32 = arith.constant 0 : i32
    %c0_i32_0 = arith.constant 0 : i32
    %c0_i32_1 = arith.constant 0 : i32
    return %c0_i32, %c0_i32_0 : i32, i32
  }
  func.func @transform_8(%arg0: i32) -> (i32, i32) {
    %c0_i32 = arith.constant 0 : i32
    %c0_i32_0 = arith.constant 0 : i32
    %c0_i32_1 = arith.constant 0 : i32
    return %c0_i32, %c0_i32_0 : i32, i32
  }
}

</mosaic_0001>

<bundles_post_ra>
// kernel: _gnn_forward_jit.1
= control target key start
LH: loop header
LB: loop body
LE: loop exit
PB: predicated region body
PF: predicated region fallthrough
CT: control target
= control target key end

     0   :  { %13 = vsyncpa [#allocation3], 0  ;;  %s1055_s27 = smov [#allocation2]   ;;  %s1264_s0 = inlined_call_operand.hbm [shape: bf16[64,64], index: 0, kind: input, shape index: {}]   ;;  %s1265_s1 = inlined_call_operand.vmem [shape: bf16[64,128], index: 1, kind: input, shape index: {}]   ;;  %s1266_s2 = inlined_call_operand.vmem [shape: bf16[128,128], index: 2, kind: input, shape index: {}]   ;;  %s1267_s3 = inlined_call_operand.vmem [shape: f32[1,128], index: 3, kind: input, shape index: {}]   ;;  %s1268_s4 = inlined_call_operand.vmem [shape: bf16[128,128], index: 4, kind: input, shape index: {}]   ;;  %s1269_s5 = inlined_call_operand.vmem [shape: f32[1,128], index: 5, kind: input, shape index: {}]   ;;  %s1270_s6 = inlined_call_operand.vmem [shape: bf16[128,128], index: 6, kind: input, shape index: {}]   ;;  %s1271_s7 = inlined_call_operand.vmem [shape: f32[1,128], index: 7, kind: input, shape index: {}]   ;;  %s1272_s8 = inlined_call_operand.vmem [shape: f32[64,128], index: 8, kind: output, shape index: {}]  }
   0x1   :  { %s19_s28 = sshll.u32 %s1055_s27, 4  ;;  %s1031_s9 = scalar_lea.hbm %s1264_s0, 512  ;;  %s20_s28 = int_to_ptr.vmem [resolvable:$true] %s19_s28 }
   0x2   :  { %p1032_p0 = scmp.ne.s32.totalorder %s1264_s0, %s1031_s9  ;;  %p1035_p1 = scmp.lt.u32.totalorder %s1031_s9, %s1264_s0 }
   0x4   :  { %p1037_p2 = pnand %p1035_p1, %p1032_p0 }
   0x6   :  { %1040 = shalt.err (!%p1037_p2)
}
   0x7   :  { %s1041_s14 = scalar_lea.vmem %s20_s28, 512  ;;  %p1046_p4 = scmp.lt.s32.totalorder %s20_s28, %s20_s28 }
   0x8   :  { %p1042_p3 = scmp.ne.s32.totalorder %s20_s28, %s1041_s14  ;;  %p1047_p5 = scmp.lt.s32.totalorder %s1041_s14, %s1041_s14 }
   0xa   :  { %p1048_p6 = por %p1047_p5, %p1046_p4 }
   0xc   :  { %p1049_p7 = pnand %p1048_p6, %p1042_p3 }
   0xe   :  { %1052 = shalt.err (!%p1049_p7)
}
   0xf   :  { %s1056_s15 = smov 64   ;;  %s1057_s16 = smov 4  }
  0x10   :  { %25 = dma.hbm_to_vmem [thread:$0]  %s1264_s0, 512, %s20_s28, [#allocation3], %s1056_s15, %s1056_s15, %s1057_s16  }
  0x11   :  { %1053 = dma.done.wait [#allocation3], 512  }
  0x12   :  { %1054 = vsyncadd [#allocation3], 4294966784  ;;  %v999_v0 = vld [vmem:[%s1266_s2] sm:$0xff]   ;;  %v1000_v1 = vld [vmem:[%s1266_s2 + $0x8] sm:$0xff]   ;;  %vm244_vm0 = vcmask 523264  }
  0x13   :  { %876 = vmatprep.subr.bf16.mxu0 %v999_v0  ;;  %v1001_v2 = vld [vmem:[%s1266_s2 + $0x10] sm:$0xff]   ;;  %v1002_v3 = vld [vmem:[%s1266_s2 + $0x18] sm:$0xff]   ;;  %v1007_v4 = vld [vmem:[%s1265_s1] sm:$0xff]  }
  0x14   :  { %877 = vmatpush3.bf16.msra.mxu0 %v999_v0  ;;  %892 = vmatprep.mubr.bf16.mxu0 %v1007_v4  ;;  %v1003_v5 = vld [vmem:[%s1266_s2 + $0x20] sm:$0xff]   ;;  %v1004_v6 = vld [vmem:[%s1266_s2 + $0x28] sm:$0xff]   ;;  %v1005_v7 = vld [vmem:[%s1266_s2 + $0x30] sm:$0xff]  }
  0x15   :  { %878 = vmatprep.subr.bf16.mxu0 %v1000_v1  ;;  %v1006_v8 = vld [vmem:[%s1266_s2 + $0x38] sm:$0xff]   ;;  %v1008_v9 = vld [vmem:[%s1265_s1 + $0x8] sm:$0xff]   ;;  %v1009_v10 = vld [vmem:[%s1265_s1 + $0x10] sm:$0xff]  }
  0x16   :  { %v1010_v11 = vld [vmem:[%s1265_s1 + $0x18] sm:$0xff]   ;;  %v1151_v12 = vld [vmem:[#allocation2] sm:$0xff]   ;;  %v1160_v26 = vld [vmem:[#allocation2 + $0x8] sm:$0xff]  }
  0x17   :  { %908 = vmatprep.mubr.msk.bf16.mxu1 %vm244_vm0, %v1151_v12  ;;  %v1015_v25 = vld [vmem:[%s1268_s4] sm:$0xff]   ;;  %v1162_v27 = vld [vmem:[#allocation2 + $0x10] sm:$0xff]   ;;  %v1016_v28 = vld [vmem:[%s1268_s4 + $0x8] sm:$0xff]  }
  0x18   :  { %879 = vmatpush3.bf16.msra.mxu0 %v1000_v1  ;;  %v1017_v29 = vld [vmem:[%s1268_s4 + $0x10] sm:$0xff]   ;;  %v1174_v30 = vld [vmem:[#allocation2 + $0x18] sm:$0xff]   ;;  %v1019_v32 = vld [vmem:[%s1268_s4 + $0x20] sm:$0xff]  }
  0x19   :  { %880 = vmatprep.subr.bf16.mxu0 %v1001_v2  ;;  %v1018_v31 = vld [vmem:[%s1268_s4 + $0x18] sm:$0xff]   ;;  %v1020_v33 = vld [vmem:[%s1268_s4 + $0x28] sm:$0xff]   ;;  %v1021_v34 = vld [vmem:[%s1268_s4 + $0x30] sm:$0xff]  }
  0x1a   :  { %v1022_v35 = vld [vmem:[%s1268_s4 + $0x38] sm:$0xff]   ;;  %v781_v36 = vld [vmem:[%s1267_s3] ss:$0 sm:$0xff] }
  0x1c   :  { %881 = vmatpush3.bf16.msra.mxu0 %v1001_v2 }
  0x1d   :  { %882 = vmatprep.subr.bf16.mxu0 %v1002_v3 }
  0x20   :  { %883 = vmatpush3.bf16.msra.mxu0 %v1002_v3 }
  0x21   :  { %884 = vmatprep.subr.bf16.mxu0 %v1003_v5 }
  0x24   :  { %885 = vmatpush3.bf16.msra.mxu0 %v1003_v5 }
  0x25   :  { %886 = vmatprep.subr.bf16.mxu0 %v1004_v6 }
  0x28   :  { %887 = vmatpush3.bf16.msra.mxu0 %v1004_v6 }
  0x29   :  { %888 = vmatprep.subr.bf16.mxu0 %v1005_v7 }
  0x2c   :  { %889 = vmatpush3.bf16.msra.mxu0 %v1005_v7 }
  0x2d   :  { %890 = vmatprep.subr.bf16.mxu0 %v1006_v8 }
  0x30   :  { %891 = vmatpush3.bf16.msra.mxu0 %v1006_v8 }
  0x33   :  { %893 = vmatmul.mubr.bf16.vlgmr.msra.gmra.mrb[0].mxu0 %v1008_v9 }
  0x34   :  { %896 = vmatprep.mubr.bf16.mxu0 %v1009_v10 }
  0x3b   :  { %897 = vmatmul.mubr.bf16.gmra.mrb[4].mxu0 %v1010_v11 }
  0x3c   :  { %948 = vmatprep.mubr.msk.bf16.mxu0 %vm244_vm0, %v1151_v12 }
 0x106   :  { %v894_v13 = vpop.f32.mrb[0].mxu0 }
 0x107   :  { %v183_v14 = vpop.f32.mrb[1].mxu0 }
 0x108   :  { %v895_v15 = vpop.f32.mrb[2].mxu0 }
 0x109   :  { %v215_v16 = vpack.c.bf16 %v895_v15, %v894_v13  ;;  %v186_v17 = vpop.f32.mrb[3].mxu0  ;;  %v1025_v15 = vld [vmem:[%s1270_s6 + $0x10] sm:$0xff]  }
 0x10a   :  { %v214_v18 = vpack.c.bf16 %v186_v17, %v183_v14  ;;  %v1024_v14 = vld [vmem:[%s1270_s6 + $0x8] sm:$0xff]   ;;  %v1027_v17 = vld [vmem:[%s1270_s6 + $0x20] sm:$0xff]  }
 0x10c   :  { %900 = vmatprep.subr.bf16.mxu1 %v214_v18 }
 0x10d   :  { %901 = vmatpush3.bf16.msra.mxu1 %v214_v18  ;;  %v1028_v18 = vld [vmem:[%s1270_s6 + $0x28] sm:$0xff]  }
 0x10e   :  { %v898_v19 = vpop.f32.mrb[4].mxu0  ;;  %902 = vmatprep.subr.bf16.mxu1 %v215_v16 }
 0x10f   :  { %v199_v20 = vpop.f32.mrb[5].mxu0 }
 0x110   :  { %v899_v21 = vpop.f32.mrb[6].mxu0 }
 0x111   :  { %v217_v22 = vpack.c.bf16 %v899_v21, %v898_v19  ;;  %v202_v23 = vpop.f32.mrb[7].mxu0  ;;  %903 = vmatpush3.bf16.msra.mxu1 %v215_v16  ;;  %v1026_v16 = vld [vmem:[%s1270_s6 + $0x18] sm:$0xff]   ;;  %v1029_v19 = vld [vmem:[%s1270_s6 + $0x30] sm:$0xff]   ;;  %v798_v21 = vld [vmem:[%s1269_s5] ss:$0 sm:$0xff] }
 0x112   :  { %v216_v24 = vpack.c.bf16 %v202_v23, %v199_v20  ;;  %v1030_v20 = vld [vmem:[%s1270_s6 + $0x38] sm:$0xff]  }
 0x114   :  { %904 = vmatprep.subr.bf16.mxu1 %v216_v24 }
 0x115   :  { %905 = vmatpush3.bf16.msra.mxu1 %v216_v24 }
 0x116   :  { %906 = vmatprep.subr.bf16.mxu1 %v217_v22 }
 0x119   :  { %907 = vmatpush3.bf16.msra.mxu1 %v217_v22 }
 0x11a   :  { %916 = vmatprep.subr.bf16.mxu1 %v1015_v25 }
 0x11c   :  { %909 = vmatmul.mubr.msk.bf16.vlgmr.msra.gmra.mrb[0].mxu1 %vm244_vm0, %v1160_v26 }
 0x11d   :  { %912 = vmatprep.mubr.msk.bf16.mxu1 %vm244_vm0, %v1162_v27  ;;  %917 = vmatpush3.bf16.msra.mxu1 %v1015_v25 }
 0x11e   :  { %918 = vmatprep.subr.bf16.mxu1 %v1016_v28 }
 0x121   :  { %919 = vmatpush3.bf16.msra.mxu1 %v1016_v28 }
 0x122   :  { %920 = vmatprep.subr.bf16.mxu1 %v1017_v29 }
 0x124   :  { %913 = vmatmul.mubr.msk.bf16.gmra.mrb[4].mxu1 %vm244_vm0, %v1174_v30 }
 0x125   :  { %921 = vmatpush3.bf16.msra.mxu1 %v1017_v29 }
 0x126   :  { %922 = vmatprep.subr.bf16.mxu1 %v1018_v31 }
 0x129   :  { %923 = vmatpush3.bf16.msra.mxu1 %v1018_v31 }
 0x12a   :  { %924 = vmatprep.subr.bf16.mxu1 %v1019_v32 }
 0x12d   :  { %925 = vmatpush3.bf16.msra.mxu1 %v1019_v32 }
 0x12e   :  { %926 = vmatprep.subr.bf16.mxu1 %v1020_v33 }
 0x131   :  { %927 = vmatpush3.bf16.msra.mxu1 %v1020_v33 }
 0x132   :  { %928 = vmatprep.subr.bf16.mxu1 %v1021_v34 }
 0x135   :  { %929 = vmatpush3.bf16.msra.mxu1 %v1021_v34 }
 0x136   :  { %930 = vmatprep.subr.bf16.mxu1 %v1022_v35 }
 0x139   :  { %931 = vmatpush3.bf16.msra.mxu1 %v1022_v35 }
 0x1ef   :  { %v910_v37 = vpop.f32.mrb[0].mxu1 }
 0x1f0   :  { %v300_v38 = vadd.f32 %v910_v37, %v781_v36  ;;  %v291_v39 = vpop.f32.mrb[1].mxu1 }
 0x1f1   :  { %v292_v40 = vadd.f32 %v781_v36, %v291_v39  ;;  %v911_v41 = vpop.f32.mrb[2].mxu1 }
 0x1f2   :  { %v303_v42 = vadd.f32 %v911_v41, %v781_v36  ;;  %v294_v43 = vpop.f32.mrb[3].mxu1  ;;  %v324_v45 = vmax.f32 %v300_v38, 0.0 }
 0x1f3   :  { %v295_v44 = vadd.f32 %v781_v36, %v294_v43  ;;  %v322_v47 = vmax.f32 %v292_v40, 0.0 }
 0x1f4   :  { %v325_v46 = vmax.f32 %v303_v42, 0.0 }
 0x1f5   :  { %v323_v48 = vmax.f32 %v295_v44, 0.0 }
 0x1f6   :  { %v331_v49 = vpack.c.bf16 %v325_v46, %v324_v45 }
 0x1f7   :  { %v330_v50 = vpack.c.bf16 %v323_v48, %v322_v47  ;;  %v914_v51 = vpop.f32.mrb[4].mxu1 }
 0x1f8   :  { %v316_v52 = vadd.f32 %v914_v51, %v781_v36  ;;  %v307_v53 = vpop.f32.mrb[5].mxu1 }
 0x1f9   :  { %v308_v54 = vadd.f32 %v781_v36, %v307_v53  ;;  %v915_v55 = vpop.f32.mrb[6].mxu1  ;;  %932 = vmatprep.mubr.bf16.mxu1 %v330_v50 }
 0x1fa   :  { %v319_v56 = vadd.f32 %v915_v55, %v781_v36  ;;  %v310_v57 = vpop.f32.mrb[7].mxu1  ;;  %933 = vmatmul.mubr.bf16.vlgmr.msra.gmra.mrb[8].mxu1 %v331_v49  ;;  %v328_v59 = vmax.f32 %v316_v52, 0.0 }
 0x1fb   :  { %v311_v58 = vadd.f32 %v781_v36, %v310_v57  ;;  %v326_v61 = vmax.f32 %v308_v54, 0.0 }
 0x1fc   :  { %v329_v60 = vmax.f32 %v319_v56, 0.0 }
 0x1fd   :  { %v327_v62 = vmax.f32 %v311_v58, 0.0 }
 0x1fe   :  { %v333_v63 = vpack.c.bf16 %v329_v60, %v328_v59 }
 0x1ff   :  { %v332_v0 = vpack.c.bf16 %v327_v62, %v326_v61 }
 0x201   :  { %936 = vmatprep.mubr.bf16.mxu1 %v332_v0 }
 0x202   :  { %937 = vmatmul.mubr.bf16.gmra.mrb[12].mxu1 %v333_v63 }
 0x203   :  { %988 = vmatprep.mubr.msk.bf16.mxu1 %vm244_vm0, %v1151_v12  ;;  %v1023_v12 = vld [vmem:[%s1270_s6] sm:$0xff]  }
 0x2cd   :  { %v934_v1 = vpop.f32.mrb[8].mxu1 }
 0x2ce   :  { %v433_v2 = vpop.f32.mrb[9].mxu1 }
 0x2cf   :  { %v935_v3 = vpop.f32.mrb[10].mxu1 }
 0x2d0   :  { %v465_v4 = vpack.c.bf16 %v935_v3, %v934_v1  ;;  %v436_v5 = vpop.f32.mrb[11].mxu1  ;;  %v811_v1 = vld [vmem:[%s1271_s7] ss:$0 sm:$0xff] }
 0x2d1   :  { %v464_v6 = vpack.c.bf16 %v436_v5, %v433_v2 }
 0x2d3   :  { %940 = vmatprep.subr.bf16.mxu0 %v464_v6 }
 0x2d4   :  { %941 = vmatpush3.bf16.msra.mxu0 %v464_v6 }
 0x2d5   :  { %v938_v7 = vpop.f32.mrb[12].mxu1  ;;  %942 = vmatprep.subr.bf16.mxu0 %v465_v4 }
 0x2d6   :  { %v449_v8 = vpop.f32.mrb[13].mxu1 }
 0x2d7   :  { %v939_v9 = vpop.f32.mrb[14].mxu1 }
 0x2d8   :  { %v467_v10 = vpack.c.bf16 %v939_v9, %v938_v7  ;;  %v452_v11 = vpop.f32.mrb[15].mxu1  ;;  %943 = vmatpush3.bf16.msra.mxu0 %v465_v4 }
 0x2d9   :  { %v466_v13 = vpack.c.bf16 %v452_v11, %v449_v8 }
 0x2db   :  { %944 = vmatprep.subr.bf16.mxu0 %v466_v13 }
 0x2dc   :  { %945 = vmatpush3.bf16.msra.mxu0 %v466_v13 }
 0x2dd   :  { %946 = vmatprep.subr.bf16.mxu0 %v467_v10 }
 0x2e0   :  { %947 = vmatpush3.bf16.msra.mxu0 %v467_v10 }
 0x2e1   :  { %956 = vmatprep.subr.bf16.mxu0 %v1023_v12 }
 0x2e3   :  { %949 = vmatmul.mubr.msk.bf16.vlgmr.msra.gmra.mrb[8].mxu0 %vm244_vm0, %v1160_v26 }
 0x2e4   :  { %952 = vmatprep.mubr.msk.bf16.mxu0 %vm244_vm0, %v1162_v27  ;;  %957 = vmatpush3.bf16.msra.mxu0 %v1023_v12 }
 0x2e5   :  { %958 = vmatprep.subr.bf16.mxu0 %v1024_v14 }
 0x2e8   :  { %959 = vmatpush3.bf16.msra.mxu0 %v1024_v14 }
 0x2e9   :  { %960 = vmatprep.subr.bf16.mxu0 %v1025_v15 }
 0x2eb   :  { %953 = vmatmul.mubr.msk.bf16.gmra.mrb[12].mxu0 %vm244_vm0, %v1174_v30 }
 0x2ec   :  { %961 = vmatpush3.bf16.msra.mxu0 %v1025_v15 }
 0x2ed   :  { %962 = vmatprep.subr.bf16.mxu0 %v1026_v16 }
 0x2f0   :  { %963 = vmatpush3.bf16.msra.mxu0 %v1026_v16 }
 0x2f1   :  { %964 = vmatprep.subr.bf16.mxu0 %v1027_v17 }
 0x2f4   :  { %965 = vmatpush3.bf16.msra.mxu0 %v1027_v17 }
 0x2f5   :  { %966 = vmatprep.subr.bf16.mxu0 %v1028_v18 }
 0x2f8   :  { %967 = vmatpush3.bf16.msra.mxu0 %v1028_v18 }
 0x2f9   :  { %968 = vmatprep.subr.bf16.mxu0 %v1029_v19 }
 0x2fc   :  { %969 = vmatpush3.bf16.msra.mxu0 %v1029_v19 }
 0x2fd   :  { %970 = vmatprep.subr.bf16.mxu0 %v1030_v20 }
 0x300   :  { %971 = vmatpush3.bf16.msra.mxu0 %v1030_v20 }
 0x3b6   :  { %v950_v22 = vpop.f32.mrb[8].mxu0 }
 0x3b7   :  { %v517_v23 = vadd.f32 %v950_v22, %v798_v21  ;;  %v508_v24 = vpop.f32.mrb[9].mxu0 }
 0x3b8   :  { %v509_v25 = vadd.f32 %v798_v21, %v508_v24  ;;  %v951_v28 = vpop.f32.mrb[10].mxu0 }
 0x3b9   :  { %v520_v29 = vadd.f32 %v951_v28, %v798_v21  ;;  %v511_v31 = vpop.f32.mrb[11].mxu0  ;;  %v541_v33 = vmax.f32 %v517_v23, 0.0 }
 0x3ba   :  { %v512_v32 = vadd.f32 %v798_v21, %v511_v31  ;;  %v539_v35 = vmax.f32 %v509_v25, 0.0 }
 0x3bb   :  { %v542_v34 = vmax.f32 %v520_v29, 0.0 }
 0x3bc   :  { %v540_v36 = vmax.f32 %v512_v32, 0.0 }
 0x3bd   :  { %v548_v37 = vpack.c.bf16 %v542_v34, %v541_v33 }
 0x3be   :  { %v547_v38 = vpack.c.bf16 %v540_v36, %v539_v35  ;;  %v954_v39 = vpop.f32.mrb[12].mxu0 }
 0x3bf   :  { %v533_v40 = vadd.f32 %v954_v39, %v798_v21  ;;  %v524_v41 = vpop.f32.mrb[13].mxu0 }
 0x3c0   :  { %v525_v42 = vadd.f32 %v798_v21, %v524_v41  ;;  %v955_v43 = vpop.f32.mrb[14].mxu0  ;;  %972 = vmatprep.mubr.bf16.mxu0 %v547_v38 }
 0x3c1   :  { %v536_v44 = vadd.f32 %v955_v43, %v798_v21  ;;  %v527_v45 = vpop.f32.mrb[15].mxu0  ;;  %973 = vmatmul.mubr.bf16.vlgmr.msra.gmra.mrb[16].mxu0 %v548_v37  ;;  %v545_v47 = vmax.f32 %v533_v40, 0.0 }
 0x3c2   :  { %v528_v46 = vadd.f32 %v798_v21, %v527_v45  ;;  %v543_v49 = vmax.f32 %v525_v42, 0.0 }
 0x3c3   :  { %v546_v48 = vmax.f32 %v536_v44, 0.0 }
 0x3c4   :  { %v544_v50 = vmax.f32 %v528_v46, 0.0 }
 0x3c5   :  { %v550_v51 = vpack.c.bf16 %v546_v48, %v545_v47 }
 0x3c6   :  { %v549_v52 = vpack.c.bf16 %v544_v50, %v543_v49 }
 0x3c8   :  { %976 = vmatprep.mubr.bf16.mxu0 %v549_v52 }
 0x3c9   :  { %977 = vmatmul.mubr.bf16.gmra.mrb[20].mxu0 %v550_v51 }
 0x494   :  { %v974_v53 = vpop.f32.mrb[16].mxu0 }
 0x495   :  { %v650_v54 = vpop.f32.mrb[17].mxu0 }
 0x496   :  { %v975_v55 = vpop.f32.mrb[18].mxu0 }
 0x497   :  { %v682_v56 = vpack.c.bf16 %v975_v55, %v974_v53  ;;  %v653_v57 = vpop.f32.mrb[19].mxu0 }
 0x498   :  { %v681_v58 = vpack.c.bf16 %v653_v57, %v650_v54 }
 0x49a   :  { %980 = vmatprep.subr.bf16.mxu1 %v681_v58 }
 0x49b   :  { %981 = vmatpush3.bf16.msra.mxu1 %v681_v58 }
 0x49c   :  { %v978_v59 = vpop.f32.mrb[20].mxu0  ;;  %982 = vmatprep.subr.bf16.mxu1 %v682_v56 }
 0x49d   :  { %v666_v60 = vpop.f32.mrb[21].mxu0 }
 0x49e   :  { %v979_v61 = vpop.f32.mrb[22].mxu0 }
 0x49f   :  { %v684_v62 = vpack.c.bf16 %v979_v61, %v978_v59  ;;  %v669_v63 = vpop.f32.mrb[23].mxu0  ;;  %983 = vmatpush3.bf16.msra.mxu1 %v682_v56 }
 0x4a0   :  { %v683_v0 = vpack.c.bf16 %v669_v63, %v666_v60 }
 0x4a2   :  { %984 = vmatprep.subr.bf16.mxu1 %v683_v0 }
 0x4a3   :  { %985 = vmatpush3.bf16.msra.mxu1 %v683_v0 }
 0x4a4   :  { %986 = vmatprep.subr.bf16.mxu1 %v684_v62 }
 0x4a7   :  { %987 = vmatpush3.bf16.msra.mxu1 %v684_v62 }
 0x4aa   :  { %989 = vmatmul.mubr.msk.bf16.vlgmr.msra.gmra.mrb[16].mxu1 %vm244_vm0, %v1160_v26 }
 0x4ab   :  { %992 = vmatprep.mubr.msk.bf16.mxu1 %vm244_vm0, %v1162_v27 }
 0x4b2   :  { %993 = vmatmul.mubr.msk.bf16.gmra.mrb[20].mxu1 %vm244_vm0, %v1174_v30 }
 0x57d   :  { %v990_v2 = vpop.f32.mrb[16].mxu1 }
 0x57e   :  { %v734_v3 = vadd.f32 %v990_v2, %v811_v1  ;;  %v725_v4 = vpop.f32.mrb[17].mxu1 }
 0x57f   :  { %v726_v5 = vadd.f32 %v811_v1, %v725_v4  ;;  %v991_v6 = vpop.f32.mrb[18].mxu1 }
 0x580   :  { %758 = vst [vmem:[%s1272_s8 + $0x10] sm:$0xff] %v734_v3  ;;  %v737_v26 = vadd.f32 %v991_v6, %v811_v1  ;;  %v728_v7 = vpop.f32.mrb[19].mxu1 }
 0x581   :  { %756 = vst [vmem:[%s1272_s8] sm:$0xff] %v726_v5  ;;  %v729_v27 = vadd.f32 %v811_v1, %v728_v7 }
 0x582   :  { %759 = vst [vmem:[%s1272_s8 + $0x18] sm:$0xff] %v737_v26 }
 0x583   :  { %757 = vst [vmem:[%s1272_s8 + $0x8] sm:$0xff] %v729_v27 }
 0x585   :  { %v994_v30 = vpop.f32.mrb[20].mxu1 }
 0x586   :  { %v750_v8 = vadd.f32 %v994_v30, %v811_v1  ;;  %v741_v9 = vpop.f32.mrb[21].mxu1 }
 0x587   :  { %v742_v10 = vadd.f32 %v811_v1, %v741_v9  ;;  %v995_v11 = vpop.f32.mrb[22].mxu1 }
 0x588   :  { %762 = vst [vmem:[%s1272_s8 + $0x30] sm:$0xff] %v750_v8  ;;  %v753_v13 = vadd.f32 %v995_v11, %v811_v1  ;;  %v744_v12 = vpop.f32.mrb[23].mxu1 }
 0x589   :  { %760 = vst [vmem:[%s1272_s8 + $0x20] sm:$0xff] %v742_v10  ;;  %v745_v14 = vadd.f32 %v811_v1, %v744_v12 }
 0x58a   :  { %763 = vst [vmem:[%s1272_s8 + $0x38] sm:$0xff] %v753_v13 }
 0x58b   :  { %761 = vst [vmem:[%s1272_s8 + $0x28] sm:$0xff] %v745_v14 }
 0x58c   :  { %768 = vsyncpa [#allocation3], 1 }

</bundles_post_ra>
